<compile_context>
chip_gen: v7x
topology: tpu7x:2x2x1
jax: 0.10.0
libtpu: 0.0.40
codegen_flags: <defaults>
</compile_context>

<pallas_src>
import functools

import jax
import jax.numpy as jnp
from jax.experimental import pallas as pl
from jax.experimental.pallas import tpu as pltpu


def _round_up(x, m):
    return (x + m - 1) // m * m


def _cdiv(a, b):
    return -(-a // b)


def _gated_conv_kernel(xm_ref, xh_ref, w_ref, b_ref, o_ref, *, shifts, cout):
    """One M-tile of the fused gated conv (single deep-K MXU dot).

    xm_ref: (Cp, TM)          bf16  main block of flattened padded input columns
    xh_ref: (Cp, HALO)        bf16  halo columns immediately after the main block
    w_ref:  (2*Cout, kk*Cp)   bf16  fused (feat|gate) weights, tap-major columns
    b_ref:  (2*Cout, 1)       f32   fused bias
    o_ref:  (Cout, TM)        f32   gated output (lane-dense store)
    """
    xm = xm_ref[...]
    xh = xh_ref[...]

    # Stacked RHS: sublane-block t holds the input columns shifted by shifts[t].
    pieces = []
    for s in shifts:
        if s == 0:
            pieces.append(xm)
        else:
            pieces.append(jnp.concatenate([xm[:, s:], xh[:, :s]], axis=1))
    rhs = jnp.concatenate(pieces, axis=0)                 # (kk*Cp, TM) bf16

    acc = jnp.dot(w_ref[...], rhs, preferred_element_type=jnp.float32)
    acc = acc + b_ref[...]                                # bias broadcast along lanes
    feat = acc[:cout, :]
    gate = acc[cout:, :]
    o_ref[...] = (feat * jax.nn.sigmoid(gate)).astype(o_ref.dtype)


@functools.partial(jax.jit, static_argnames=("kernel", "padding", "dilation"))
def conv_relu_forward(x, w_feat, b_feat, w_gate, b_gate,
                      kernel=3, padding=1, dilation=1):
    """GatedConv forward (stride=1). x: NCHW f32; weights PyTorch-shaped
    (out_c, in_c, k, k); biases (out_c,).  Returns NCHW f32."""
    N, C, H, W = x.shape
    Cout = w_feat.shape[0]
    k, p, d = kernel, padding, dilation
    kk = k * k

    H_pad, W_pad = H + 2 * p, W + 2 * p
    H_out = H_pad - d * (k - 1)
    W_out = W_pad - d * (k - 1)

    # Constant per-tap column shifts in the flattened padded grid.
    shifts = tuple(ki * d * W_pad + kj * d for ki in range(k) for kj in range(k))
    max_shift = shifts[-1]

    Cp = _round_up(max(C, 1), 16)            # bf16 packs 16 sublanes per vreg
    HALO = max(128, _round_up(max_shift, 128))

    # ---- tile sizing (budget safe under v7x's 64 MiB physical VMEM) ----
    M_base = N * H_pad * W_pad
    bytes_per_col = (2 * Cp * 2              # main block, double-buffered bf16
                     + 2 * Cout * 4 * 2      # output block, double-buffered f32
                     + 2 * kk * Cp * 2       # stacked RHS + slice temps, bf16
                     + 2 * (2 * Cout) * 4)   # f32 dot result + epilogue temps
    vmem_budget = 20 * 1024 * 1024
    tm_cap = max(HALO, (vmem_budget // bytes_per_col) // HALO * HALO)

    TM = _round_up(16384, HALO)                           # big-tile target
    TM = min(TM, tm_cap)                                  # VMEM budget
    if M_base >= 64 * HALO:                               # keep >= ~8 steps (v7x 2 TCs)
        TM = min(TM, max(8 * HALO, _round_up(_cdiv(M_base, 8), HALO)))
    TM = min(TM, max(_round_up(M_base, HALO), 8 * HALO))  # don't overshoot tiny inputs
    TM = max(TM, min(8 * HALO, tm_cap), HALO)             # halo re-read <= 12.5% if possible
    nhalo = TM // HALO

    M_pad = _round_up(M_base, TM)
    M_in = M_pad + HALO                # room for the last block's halo (>= max_shift)

    # ---- input prep: bf16 -> NCHW spatial pad -> (Cp, M_in) slab ----
    xb = x.astype(jnp.bfloat16)
    xb = jnp.pad(xb, ((0, 0), (0, 0), (p, p), (p, p)))           # (N, C, Hp, Wp)
    xt = jnp.transpose(xb, (1, 0, 2, 3)).reshape(C, M_base)      # (C, M), contiguous rows
    xt = jnp.pad(xt, ((0, Cp - C), (0, M_in - M_base)))          # channel + tail zero-pad

    # ---- fused weights/bias: (2*Cout, kk*Cp) bf16, (2*Cout, 1) f32 ----
    wb = jnp.concatenate([w_feat, w_gate], axis=0)               # (2*Cout, C, k, k)
    wb = jnp.pad(wb, ((0, 0), (0, Cp - C), (0, 0), (0, 0)))      # (2*Cout, Cp, k, k)
    wcat = jnp.transpose(wb, (0, 2, 3, 1)).reshape(2 * Cout, kk * Cp)
    wcat = wcat.astype(jnp.bfloat16)
    bcat = jnp.concatenate([b_feat, b_gate]).reshape(2 * Cout, 1).astype(jnp.float32)

    grid = (M_pad // TM,)
    kern = functools.partial(_gated_conv_kernel, shifts=shifts, cout=Cout)

    out_t = pl.pallas_call(
        kern,
        out_shape=jax.ShapeDtypeStruct((Cout, M_pad), jnp.float32),
        grid_spec=pltpu.PrefetchScalarGridSpec(
            num_scalar_prefetch=0,
            grid=grid,
            in_specs=[
                # main slab: columns [i*TM, (i+1)*TM)
                pl.BlockSpec((Cp, TM), lambda i: (0, i)),
                # halo: columns [(i+1)*TM, (i+1)*TM + HALO)
                pl.BlockSpec((Cp, HALO), lambda i, nh=nhalo: (0, (i + 1) * nh)),
                # fused weights / bias: resident (constant block index -> one DMA)
                pl.BlockSpec((2 * Cout, kk * Cp), lambda i: (0, 0)),
                pl.BlockSpec((2 * Cout, 1), lambda i: (0, 0)),
            ],
            out_specs=pl.BlockSpec((Cout, TM), lambda i: (0, i)),
        ),
        compiler_params=pltpu.CompilerParams(
            dimension_semantics=("parallel",),
            vmem_limit_bytes=40 * 1024 * 1024,
        ),
    )(xt, xt, wcat, bcat)

    # (Cout, M) -> NCHW.  TODO(synk): emit the consumer's preferred layout to
    # fuse away this crop/transpose pass if the surrounding model allows it.
    out = out_t[:, :M_base].reshape(Cout, N, H_pad, W_pad)[:, :, :H_out, :W_out]
    return jnp.transpose(out, (1, 0, 2, 3))


def _reference(x, w_feat, b_feat, w_gate, b_gate, kernel, padding, dilation):
    dn = jax.lax.conv_dimension_numbers(x.shape, w_feat.shape,
                                        ("NCHW", "OIHW", "NCHW"))
    conv = functools.partial(
        jax.lax.conv_general_dilated,
        window_strides=(1, 1),
        padding=[(padding, padding), (padding, padding)],
        rhs_dilation=(dilation, dilation),
        dimension_numbers=dn,
    )
    feat = conv(x, w_feat) + b_feat[None, :, None, None]
    gate = conv(x, w_gate) + b_gate[None, :, None, None]
    return feat * jax.nn.sigmoid(gate)


if __name__ == "__main__":
    key = jax.random.PRNGKey(0)
    k_x, k_wf, k_bf, k_wg, k_bg = jax.random.split(key, 5)

    N, Cin, H, W = 2, 4, 16, 16
    Cout, ksz, pad, dil = 8, 3, 1, 1

    x = jax.random.normal(k_x, (N, Cin, H, W), jnp.float32)
    fan_in = Cin * ksz * ksz
    scale = 1.0 / (fan_in ** 0.5)
    w_feat = jax.random.normal(k_wf, (Cout, Cin, ksz, ksz), jnp.float32) * scale
    b_feat = jax.random.normal(k_bf, (Cout,), jnp.float32) * scale
    w_gate = jax.random.normal(k_wg, (Cout, Cin, ksz, ksz), jnp.float32) * scale
    b_gate = jax.random.normal(k_bg, (Cout,), jnp.float32) * scale

    out = conv_relu_forward(x, w_feat, b_feat, w_gate, b_gate,
                            kernel=ksz, padding=pad, dilation=dil)
    out = jax.block_until_ready(out)

    # Reference with bf16-rounded dot inputs (kernel uses bf16 MXU inputs with
    # f32 accumulation), f32 everywhere else.
    xq = x.astype(jnp.bfloat16).astype(jnp.float32)
    wfq = w_feat.astype(jnp.bfloat16).astype(jnp.float32)
    wgq = w_gate.astype(jnp.bfloat16).astype(jnp.float32)
    ref = _reference(xq, wfq, b_feat, wgq, b_gate, ksz, pad, dil)

    assert out.shape == (N, Cout, H, W), out.shape
    max_err = float(jnp.max(jnp.abs(out - ref)))
    assert jnp.allclose(out, ref, atol=2e-3, rtol=2e-3), max_err

    print("KERNEL_OK")
</pallas_src>

<mosaic_0001>
module attributes {stable_mosaic.version = 11 : i64} {
  func.func @_gated_conv_kernel(%arg0: i32, %arg1: memref<16x1024xbf16, #tpu.memory_space<vmem>>, %arg2: memref<16x128xbf16, #tpu.memory_space<vmem>>, %arg3: memref<16x144xbf16, #tpu.memory_space<vmem>>, %arg4: memref<16x1xf32, #tpu.memory_space<vmem>>, %arg5: memref<8x1024xf32, #tpu.memory_space<vmem>>) attributes {dimension_semantics = [#tpu.dimension_semantics<parallel>], iteration_bounds = array<i64: 1>, scalar_prefetch = 0 : i64, scratch_operands = 0 : i64, tpu.core_type = #tpu.core_type<tc>, window_params = [{transform_indices = @transform_0, window_bounds = array<i64: 16, 1024>}, {transform_indices = @transform_1, window_bounds = array<i64: 16, 128>}, {pipeline_mode = #tpu.pipeline_mode<synchronous>, transform_indices = @transform_2, window_bounds = array<i64: 16, 144>}, {pipeline_mode = #tpu.pipeline_mode<synchronous>, transform_indices = @transform_3, window_bounds = array<i64: 16, 1>}, {transform_indices = @transform_4, window_bounds = array<i64: 8, 1024>}]} {
    %c0 = arith.constant 0 : index
    %c0_0 = arith.constant 0 : index
    %0 = vector.load %arg1[%c0, %c0_0] : memref<16x1024xbf16, #tpu.memory_space<vmem>>, vector<16x1024xbf16>
    %c0_1 = arith.constant 0 : index
    %c0_2 = arith.constant 0 : index
    %1 = vector.load %arg2[%c0_1, %c0_2] : memref<16x128xbf16, #tpu.memory_space<vmem>>, vector<16x128xbf16>
    %2 = vector.extract_strided_slice %0 {offsets = [0, 1], sizes = [16, 1023], strides = [1, 1]} : vector<16x1024xbf16> to vector<16x1023xbf16>
    %3 = vector.extract_strided_slice %1 {offsets = [0, 0], sizes = [16, 1], strides = [1, 1]} : vector<16x128xbf16> to vector<16x1xbf16>
    %4 = tpu.concatenate %2, %3 in 1 : vector<16x1023xbf16>, vector<16x1xbf16> -> vector<16x1024xbf16>
    %5 = vector.extract_strided_slice %0 {offsets = [0, 2], sizes = [16, 1022], strides = [1, 1]} : vector<16x1024xbf16> to vector<16x1022xbf16>
    %6 = vector.extract_strided_slice %1 {offsets = [0, 0], sizes = [16, 2], strides = [1, 1]} : vector<16x128xbf16> to vector<16x2xbf16>
    %7 = tpu.concatenate %5, %6 in 1 : vector<16x1022xbf16>, vector<16x2xbf16> -> vector<16x1024xbf16>
    %8 = vector.extract_strided_slice %0 {offsets = [0, 18], sizes = [16, 1006], strides = [1, 1]} : vector<16x1024xbf16> to vector<16x1006xbf16>
    %9 = vector.extract_strided_slice %1 {offsets = [0, 0], sizes = [16, 18], strides = [1, 1]} : vector<16x128xbf16> to vector<16x18xbf16>
    %10 = tpu.concatenate %8, %9 in 1 : vector<16x1006xbf16>, vector<16x18xbf16> -> vector<16x1024xbf16>
    %11 = vector.extract_strided_slice %0 {offsets = [0, 19], sizes = [16, 1005], strides = [1, 1]} : vector<16x1024xbf16> to vector<16x1005xbf16>
    %12 = vector.extract_strided_slice %1 {offsets = [0, 0], sizes = [16, 19], strides = [1, 1]} : vector<16x128xbf16> to vector<16x19xbf16>
    %13 = tpu.concatenate %11, %12 in 1 : vector<16x1005xbf16>, vector<16x19xbf16> -> vector<16x1024xbf16>
    %14 = vector.extract_strided_slice %0 {offsets = [0, 20], sizes = [16, 1004], strides = [1, 1]} : vector<16x1024xbf16> to vector<16x1004xbf16>
    %15 = vector.extract_strided_slice %1 {offsets = [0, 0], sizes = [16, 20], strides = [1, 1]} : vector<16x128xbf16> to vector<16x20xbf16>
    %16 = tpu.concatenate %14, %15 in 1 : vector<16x1004xbf16>, vector<16x20xbf16> -> vector<16x1024xbf16>
    %17 = vector.extract_strided_slice %0 {offsets = [0, 36], sizes = [16, 988], strides = [1, 1]} : vector<16x1024xbf16> to vector<16x988xbf16>
    %18 = vector.extract_strided_slice %1 {offsets = [0, 0], sizes = [16, 36], strides = [1, 1]} : vector<16x128xbf16> to vector<16x36xbf16>
    %19 = tpu.concatenate %17, %18 in 1 : vector<16x988xbf16>, vector<16x36xbf16> -> vector<16x1024xbf16>
    %20 = vector.extract_strided_slice %0 {offsets = [0, 37], sizes = [16, 987], strides = [1, 1]} : vector<16x1024xbf16> to vector<16x987xbf16>
    %21 = vector.extract_strided_slice %1 {offsets = [0, 0], sizes = [16, 37], strides = [1, 1]} : vector<16x128xbf16> to vector<16x37xbf16>
    %22 = tpu.concatenate %20, %21 in 1 : vector<16x987xbf16>, vector<16x37xbf16> -> vector<16x1024xbf16>
    %23 = vector.extract_strided_slice %0 {offsets = [0, 38], sizes = [16, 986], strides = [1, 1]} : vector<16x1024xbf16> to vector<16x986xbf16>
    %24 = vector.extract_strided_slice %1 {offsets = [0, 0], sizes = [16, 38], strides = [1, 1]} : vector<16x128xbf16> to vector<16x38xbf16>
    %25 = tpu.concatenate %23, %24 in 1 : vector<16x986xbf16>, vector<16x38xbf16> -> vector<16x1024xbf16>
    %26 = tpu.concatenate %0, %4, %7, %10, %13, %16, %19, %22, %25 in 0 : vector<16x1024xbf16>, vector<16x1024xbf16>, vector<16x1024xbf16>, vector<16x1024xbf16>, vector<16x1024xbf16>, vector<16x1024xbf16>, vector<16x1024xbf16>, vector<16x1024xbf16>, vector<16x1024xbf16> -> vector<144x1024xbf16>
    %c0_3 = arith.constant 0 : index
    %c0_4 = arith.constant 0 : index
    %27 = vector.load %arg3[%c0_3, %c0_4] : memref<16x144xbf16, #tpu.memory_space<vmem>>, vector<16x144xbf16>
    %cst = arith.constant dense<0.000000e+00> : vector<16x1024xf32>
    %28 = tpu.matmul %27, %26, %cst {dimension_numbers = #tpu.dot_dimension_numbers<[1], [0], [0], [1], [0, 0, 1, 1], [], []>} : vector<16x144xbf16>, vector<144x1024xbf16>, vector<16x1024xf32> -> vector<16x1024xf32>
    %c0_5 = arith.constant 0 : index
    %c0_6 = arith.constant 0 : index
    %29 = vector.load %arg4[%c0_5, %c0_6] : memref<16x1xf32, #tpu.memory_space<vmem>>, vector<16x1xf32>
    %30 = vector.broadcast %29 : vector<16x1xf32> to vector<16x1024xf32>
    %31 = arith.addf %28, %30 : vector<16x1024xf32>
    %32 = vector.extract_strided_slice %31 {offsets = [0, 0], sizes = [8, 1024], strides = [1, 1]} : vector<16x1024xf32> to vector<8x1024xf32>
    %33 = vector.extract_strided_slice %31 {offsets = [8, 0], sizes = [8, 1024], strides = [1, 1]} : vector<16x1024xf32> to vector<8x1024xf32>
    %34 = arith.negf %33 : vector<8x1024xf32>
    %35 = math.exp %34 : vector<8x1024xf32>
    %cst_7 = arith.constant 1.000000e+00 : f32
    %36 = vector.broadcast %cst_7 : f32 to vector<8x1024xf32>
    %37 = arith.addf %36, %35 : vector<8x1024xf32>
    %38 = arith.divf %36, %37 : vector<8x1024xf32>
    %39 = arith.mulf %32, %38 : vector<8x1024xf32>
    %c0_8 = arith.constant 0 : index
    %c0_9 = arith.constant 0 : index
    %40 = vector.load %arg5[%c0_8, %c0_9] : memref<8x1024xf32, #tpu.memory_space<vmem>>, vector<8x1024xf32>
    tpu.vector_store %arg5[%c0_8, %c0_9], %39 {strides = array<i32>} : memref<8x1024xf32, #tpu.memory_space<vmem>>, vector<8x1024xf32>,
    return
  }
  func.func @transform_0(%arg0: i32) -> (i32, i32) {
    %c0_i32 = arith.constant 0 : i32
    %c0_i32_0 = arith.constant 0 : i32
    return %c0_i32, %arg0 : i32, i32
  }
  func.func @transform_1(%arg0: i32) -> (i32, i32) {
    %c1_i32 = arith.constant 1 : i32
    %0 = arith.addi %arg0, %c1_i32 : i32
    %c8_i32 = arith.constant 8 : i32
    %1 = arith.muli %0, %c8_i32 : i32
    %c0_i32 = arith.constant 0 : i32
    %c0_i32_0 = arith.constant 0 : i32
    return %c0_i32, %1 : i32, i32
  }
  func.func @transform_2(%arg0: i32) -> (i32, i32) {
    %c0_i32 = arith.constant 0 : i32
    %c0_i32_0 = arith.constant 0 : i32
    %c0_i32_1 = arith.constant 0 : i32
    return %c0_i32, %c0_i32_0 : i32, i32
  }
  func.func @transform_3(%arg0: i32) -> (i32, i32) {
    %c0_i32 = arith.constant 0 : i32
    %c0_i32_0 = arith.constant 0 : i32
    %c0_i32_1 = arith.constant 0 : i32
    return %c0_i32, %c0_i32_0 : i32, i32
  }
  func.func @transform_4(%arg0: i32) -> (i32, i32) {
    %c0_i32 = arith.constant 0 : i32
    %c0_i32_0 = arith.constant 0 : i32
    return %c0_i32, %arg0 : i32, i32
  }
}

</mosaic_0001>

<bundles_post_ra>
// kernel: conv_relu_forward.1
= control target key start
LH: loop header
LB: loop body
LE: loop exit
PB: predicated region body
PF: predicated region fallthrough
CT: control target
= control target key end

     0   :  { %s821_s19 = smov 127   ;;  %s822_s30 = smov 126   ;;  %vm484_vm0 = vcmask 130048   ;;  %vm160_vm1 = vcmask 1039360   ;;  %vm203_vm2 = vcmask 1031168   ;;  %vm241_vm3 = vcmask 900096   ;;  %s1169_s0 = inlined_call_operand.vmem [shape: bf16[16,1152], index: 0, kind: input, shape index: {}, may-alias: {0,1}]   ;;  %s1170_s1 = inlined_call_operand.vmem [shape: bf16[16,1152], index: 1, kind: input, shape index: {}, may-alias: {0,1}]   ;;  %s1171_s2 = inlined_call_operand.vmem [shape: bf16[16,144], index: 2, kind: input, shape index: {}]   ;;  %s1172_s3 = inlined_call_operand.vmem [shape: f32[16,1], index: 3, kind: input, shape index: {}]   ;;  %s1173_s4 = inlined_call_operand.vmem [shape: f32[8,1024], index: 4, kind: output, shape index: {}]  }
   0x1   :  { %v773_v0 = vld [vmem:[%s1169_s0 + $0xc] ss:$36 sps:$4 sm:$0xff]   ;;  %v775_v1 = vld [vmem:[%s1169_s0 + $0x4] ss:$36 sps:$4 sm:$0xff]   ;;  %v737_v5 = vld [vmem:[%s1170_s1 + $0x20] sm:$0xf] }
   0x2   :  { %150 = vrot.lane.b32.xlu1 %v773_v0, %s821_s19  ;;  %v865_v2 = vld [vmem:[%s1169_s0 + $0x10] ss:$36 sps:$4 sm:$0xff]   ;;  %531 = vmatprep.subr.bf16.mxu1 %v773_v0  ;;  %v779_v3 = vld [vmem:[%s1169_s0 + $0x8] ss:$36 sps:$4 sm:$0xff]   ;;  %v780_v4 = vld [vmem:[%s1169_s0] ss:$36 sps:$4 sm:$0xff]  }
   0x3   :  { %146 = vrot.lane.b32.xlu0 %v775_v1, %s821_s19  ;;  %488 = vmatprep.subr.bf16.mxu0 %v775_v1  ;;  %v738_v6 = vld [vmem:[%s1170_s1 + $0x44] sm:$0xf]  ;;  %64 = vst [vmem:[#allocation3] sm:$0xf] %v737_v5  ;;  %s823_s1 = smov 110   ;;  %s824_s5 = smov 109  }
   0x4   :  { %532 = vmatpush1.bf16.msra.mxu1 %v779_v3  ;;  %489 = vmatpush1.bf16.msra.mxu0 %v780_v4  ;;  %66 = vst [vmem:[#allocation3 + $0x4] sm:$0xf] %v738_v6  ;;  %s825_s6 = smov 108   ;;  %s826_s7 = smov 92   ;;  %v922_v7 = vld [vmem:[%s1171_s2 + $0x4] ss:$8 sps:$4 sm:$0xff]  }
   0x5   :  { %s827_s8 = smov 91   ;;  %s828_s11 = smov 90   ;;  %750 = vmatprep.mubr.msk.bf16.mxu0 %vm484_vm0, %v922_v7  ;;  %751 = vmatprep.mubr.msk.bf16.mxu1 %vm484_vm0, %v922_v7  ;;  %v936_v8 = vld [vmem:[%s1169_s0 + $0x18] ss:$36 sps:$4 sm:$0xff]   ;;  %v829_v31 = vmov 0   ;;  %v463_v38 = vld [vmem:[%s1172_s3] sm:$0xff] }
   0x6   :  { %152 = vrot.lane.b32.xlu1 %v865_v2, %s821_s19  ;;  %v943_v9 = vld [vmem:[%s1169_s0 + $0x14] ss:$36 sps:$4 sm:$0xff]   ;;  %v954_v11 = vld [vmem:[%s1169_s0 + $0x1c] ss:$36 sps:$4 sm:$0xff]   ;;  %771 = vset.pattern.permute.xlu0 %v829_v31  ;;  %v464_v40 = vld [vmem:[%s1172_s3 + $0x8] sm:$0xff]  ;;  %vm279_vm4 = vcmask 891904  }
   0x7   :  { %148 = vrot.lane.b32.xlu0 %v779_v3, %s821_s19  ;;  %772 = vset.pattern.permute.xlu1 %v829_v31  ;;  %vm317_vm5 = vcmask 883712   ;;  %vm355_vm6 = vcmask 752640   ;;  %vm393_vm7 = vcmask 744448   ;;  %vm431_vm8 = vcmask 736256  }
   0xa   :  { %189 = vrot.lane.b32.xlu1 %v775_v1, %s822_s30 }
   0xb   :  { %144 = vrot.lane.b32.xlu0 %v780_v4, %s821_s19  ;;  %v947_v10 = vld [vmem:[#allocation3] sm:$0xff]  }
   0xe   :  { %193 = vrot.lane.b32.xlu1 %v773_v0, %s822_s30 }
   0xf   :  { %191 = vrot.lane.b32.xlu0 %v779_v3, %s822_s30 }
  0x12   :  { %187 = vrot.lane.b32.xlu1 %v780_v4, %s822_s30 }
  0x13   :  { %195 = vrot.lane.b32.xlu0 %v865_v2, %s822_s30 }
  0x16   :  { %229 = vrot.lane.b32.xlu1 %v779_v3, %s823_s1 }
  0x17   :  { %227 = vrot.lane.b32.xlu0 %v775_v1, %s823_s1 }
  0x1a   :  { %233 = vrot.lane.b32.xlu1 %v865_v2, %s823_s1 }
  0x1b   :  { %231 = vrot.lane.b32.xlu0 %v773_v0, %s823_s1 }
  0x1e   :  { %265 = vrot.lane.b32.xlu1 %v775_v1, %s824_s5 }
  0x1f   :  { %225 = vrot.lane.b32.xlu0 %v780_v4, %s823_s1 }
  0x22   :  { %269 = vrot.lane.b32.xlu1 %v773_v0, %s824_s5 }
  0x23   :  { %267 = vrot.lane.b32.xlu0 %v779_v3, %s824_s5 }
  0x26   :  { %263 = vrot.lane.b32.xlu1 %v780_v4, %s824_s5 }
  0x27   :  { %271 = vrot.lane.b32.xlu0 %v865_v2, %s824_s5 }
  0x2a   :  { %305 = vrot.lane.b32.xlu1 %v779_v3, %s825_s6 }
  0x2b   :  { %303 = vrot.lane.b32.xlu0 %v775_v1, %s825_s6 }
  0x2e   :  { %309 = vrot.lane.b32.xlu1 %v865_v2, %s825_s6 }
  0x2f   :  { %307 = vrot.lane.b32.xlu0 %v773_v0, %s825_s6 }
  0x32   :  { %341 = vrot.lane.b32.xlu1 %v775_v1, %s826_s7 }
  0x33   :  { %301 = vrot.lane.b32.xlu0 %v780_v4, %s825_s6 }
  0x36   :  { %345 = vrot.lane.b32.xlu1 %v773_v0, %s826_s7 }
  0x37   :  { %343 = vrot.lane.b32.xlu0 %v779_v3, %s826_s7 }
  0x3a   :  { %339 = vrot.lane.b32.xlu1 %v780_v4, %s826_s7 }
  0x3b   :  { %347 = vrot.lane.b32.xlu0 %v865_v2, %s826_s7 }
  0x3e   :  { %381 = vrot.lane.b32.xlu1 %v779_v3, %s827_s8 }
  0x3f   :  { %379 = vrot.lane.b32.xlu0 %v775_v1, %s827_s8 }
  0x42   :  { %385 = vrot.lane.b32.xlu1 %v865_v2, %s827_s8 }
  0x43   :  { %383 = vrot.lane.b32.xlu0 %v773_v0, %s827_s8 }
  0x46   :  { %417 = vrot.lane.b32.xlu1 %v775_v1, %s828_s11 }
  0x47   :  { %377 = vrot.lane.b32.xlu0 %v780_v4, %s827_s8 }
  0x4a   :  { %421 = vrot.lane.b32.xlu1 %v773_v0, %s828_s11 }
  0x4b   :  { %419 = vrot.lane.b32.xlu0 %v779_v3, %s828_s11 }
  0x4e   :  { %415 = vrot.lane.b32.xlu1 %v780_v4, %s828_s11 }
  0x4f   :  { %423 = vrot.lane.b32.xlu0 %v865_v2, %s828_s11 }
  0x52   :  { %156 = vrot.lane.b32.xlu1 %v936_v8, %s821_s19 }
  0x53   :  { %154 = vrot.lane.b32.xlu0 %v943_v9, %s821_s19 }
  0x56   :  { %180 = vrot.lane.b32.xlu1 %v947_v10, %s821_s19 }
  0x57   :  { %158 = vrot.lane.b32.xlu0 %v954_v11, %s821_s19 }
  0x5a   :  { %199 = vrot.lane.b32.xlu1 %v936_v8, %s822_s30 }
  0x5b   :  { %197 = vrot.lane.b32.xlu0 %v943_v9, %s822_s30 }
  0x5e   :  { %218 = vrot.lane.b32.xlu1 %v947_v10, %s822_s30 }
  0x5f   :  { %201 = vrot.lane.b32.xlu0 %v954_v11, %s822_s30 }
  0x62   :  { %237 = vrot.lane.b32.xlu1 %v936_v8, %s823_s1 }
  0x63   :  { %235 = vrot.lane.b32.xlu0 %v943_v9, %s823_s1 }
  0x66   :  { %256 = vrot.lane.b32.xlu1 %v947_v10, %s823_s1 }
  0x67   :  { %239 = vrot.lane.b32.xlu0 %v954_v11, %s823_s1 }
  0x6a   :  { %275 = vrot.lane.b32.xlu1 %v936_v8, %s824_s5 }
  0x6b   :  { %273 = vrot.lane.b32.xlu0 %v943_v9, %s824_s5 }
  0x6e   :  { %294 = vrot.lane.b32.xlu1 %v947_v10, %s824_s5 }
  0x6f   :  { %277 = vrot.lane.b32.xlu0 %v954_v11, %s824_s5 }
  0x72   :  { %313 = vrot.lane.b32.xlu1 %v936_v8, %s825_s6 }
  0x73   :  { %311 = vrot.lane.b32.xlu0 %v943_v9, %s825_s6 }
  0x74   :  { %v151_v12 = vpop.permute.xlu1 %150 }
  0x75   :  { %v147_v13 = vpop.permute.xlu0 %146 }
  0x76   :  { %332 = vrot.lane.b32.xlu1 %v947_v10, %s825_s6 }
  0x77   :  { %315 = vrot.lane.b32.xlu0 %v954_v11, %s825_s6 }
  0x78   :  { %v992_v14 = vpop.permute.xlu1 %152 }
  0x79   :  { %v149_v15 = vpop.permute.xlu0 %148  ;;  %v164_v16 = vsel %vm160_vm1, %v151_v12, %v992_v14 }
  0x7a   :  { %533 = vmatprep.subr.bf16.mxu1 %v164_v16  ;;  %351 = vrot.lane.b32.xlu1 %v936_v8, %s826_s7  ;;  %v162_v17 = vsel %vm160_vm1, %v147_v13, %v149_v15  ;;  %v163_v18 = vsel %vm160_vm1, %v149_v15, %v151_v12 }
  0x7b   :  { %349 = vrot.lane.b32.xlu0 %v943_v9, %s826_s7  ;;  %490 = vmatprep.subr.bf16.mxu0 %v162_v17 }
  0x7c   :  { %534 = vmatpush1.bf16.msra.mxu1 %v163_v18  ;;  %v190_v19 = vpop.permute.xlu1 %189 }
  0x7d   :  { %v145_v20 = vpop.permute.xlu0 %144 }
  0x7e   :  { %370 = vrot.lane.b32.xlu1 %v947_v10, %s826_s7  ;;  %v161_v21 = vsel %vm160_vm1, %v145_v20, %v147_v13 }
  0x7f   :  { %353 = vrot.lane.b32.xlu0 %v954_v11, %s826_s7  ;;  %491 = vmatpush1.bf16.msra.mxu0 %v161_v21 }
  0x80   :  { %v194_v22 = vpop.permute.xlu1 %193 }
  0x81   :  { %v192_v23 = vpop.permute.xlu0 %191 }
  0x82   :  { %389 = vrot.lane.b32.xlu1 %v936_v8, %s827_s8  ;;  %v205_v24 = vsel %vm203_vm2, %v190_v19, %v192_v23  ;;  %v206_v29 = vsel %vm203_vm2, %v192_v23, %v194_v22 }
  0x83   :  { %387 = vrot.lane.b32.xlu0 %v943_v9, %s827_s8  ;;  %492 = vmatprep.subr.bf16.mxu0 %v205_v24 }
  0x84   :  { %v188_v25 = vpop.permute.xlu1 %187 }
  0x85   :  { %v1012_v26 = vpop.permute.xlu0 %195  ;;  %v204_v27 = vsel %vm203_vm2, %v188_v25, %v190_v19 }
  0x86   :  { %408 = vrot.lane.b32.xlu1 %v947_v10, %s827_s8  ;;  %493 = vmatpush1.bf16.msra.mxu0 %v204_v27  ;;  %v207_v28 = vsel %vm203_vm2, %v194_v22, %v1012_v26 }
  0x87   :  { %391 = vrot.lane.b32.xlu0 %v954_v11, %s827_s8  ;;  %535 = vmatprep.subr.bf16.mxu1 %v207_v28  ;;  %v1078_v28 = vld [vmem:[%s1171_s2] ss:$8 sps:$4 sm:$0xff]  }
  0x88   :  { %536 = vmatpush1.bf16.msra.mxu1 %v206_v29  ;;  %v230_v30 = vpop.permute.xlu1 %229 }
  0x89   :  { %v228_v32 = vpop.permute.xlu0 %227 }
  0x8a   :  { %427 = vrot.lane.b32.xlu1 %v936_v8, %s828_s11  ;;  %v243_v33 = vsel %vm241_vm3, %v228_v32, %v230_v30 }
  0x8b   :  { %425 = vrot.lane.b32.xlu0 %v943_v9, %s828_s11  ;;  %494 = vmatprep.subr.bf16.mxu0 %v243_v33 }
  0x8c   :  { %v1027_v34 = vpop.permute.xlu1 %233 }
  0x8d   :  { %v232_v35 = vpop.permute.xlu0 %231 }
  0x8e   :  { %446 = vrot.lane.b32.xlu1 %v947_v10, %s828_s11  ;;  %v245_v36 = vsel %vm241_vm3, %v232_v35, %v1027_v34  ;;  %v244_v37 = vsel %vm241_vm3, %v230_v30, %v232_v35 }
  0x8f   :  { %429 = vrot.lane.b32.xlu0 %v954_v11, %s828_s11  ;;  %537 = vmatprep.subr.bf16.mxu1 %v245_v36 }
  0x90   :  { %538 = vmatpush1.bf16.msra.mxu1 %v244_v37  ;;  %v266_v39 = vpop.permute.xlu1 %265 }
  0x91   :  { %v226_v41 = vpop.permute.xlu0 %225 }
  0x92   :  { %v242_v42 = vsel %vm241_vm3, %v226_v41, %v228_v32  ;;  %467 = vperm.xlu1 %772, %v463_v38  }
  0x93   :  { %495 = vmatpush1.bf16.msra.mxu0 %v242_v42  ;;  %472 = vperm.xlu0 %771, %v464_v40  }
  0x94   :  { %v270_v43 = vpop.permute.xlu1 %269 }
  0x95   :  { %v268_v44 = vpop.permute.xlu0 %267 }
  0x96   :  { %v281_v45 = vsel %vm279_vm4, %v266_v39, %v268_v44  ;;  %v282_v50 = vsel %vm279_vm4, %v268_v44, %v270_v43 }
  0x97   :  { %496 = vmatprep.subr.bf16.mxu0 %v281_v45 }
  0x98   :  { %v264_v46 = vpop.permute.xlu1 %263 }
  0x99   :  { %v1044_v47 = vpop.permute.xlu0 %271  ;;  %v280_v48 = vsel %vm279_vm4, %v264_v46, %v266_v39 }
  0x9a   :  { %497 = vmatpush1.bf16.msra.mxu0 %v280_v48  ;;  %v283_v49 = vsel %vm279_vm4, %v270_v43, %v1044_v47 }
  0x9b   :  { %539 = vmatprep.subr.bf16.mxu1 %v283_v49 }
  0x9c   :  { %540 = vmatpush1.bf16.msra.mxu1 %v282_v50  ;;  %v306_v51 = vpop.permute.xlu1 %305 }
  0x9d   :  { %v304_v52 = vpop.permute.xlu0 %303 }
  0x9e   :  { %v319_v53 = vsel %vm317_vm5, %v304_v52, %v306_v51 }
  0x9f   :  { %498 = vmatprep.subr.bf16.mxu0 %v319_v53 }
  0xa0   :  { %v1051_v54 = vpop.permute.xlu1 %309 }
  0xa1   :  { %v308_v55 = vpop.permute.xlu0 %307 }
  0xa2   :  { %v321_v56 = vsel %vm317_vm5, %v308_v55, %v1051_v54  ;;  %v320_v57 = vsel %vm317_vm5, %v306_v51, %v308_v55 }
  0xa3   :  { %541 = vmatprep.subr.bf16.mxu1 %v321_v56 }
  0xa4   :  { %542 = vmatpush1.bf16.msra.mxu1 %v320_v57  ;;  %v342_v58 = vpop.permute.xlu1 %341 }
  0xa5   :  { %v302_v59 = vpop.permute.xlu0 %301 }
  0xa6   :  { %v318_v60 = vsel %vm317_vm5, %v302_v59, %v304_v52 }
  0xa7   :  { %499 = vmatpush1.bf16.msra.mxu0 %v318_v60 }
  0xa8   :  { %v346_v61 = vpop.permute.xlu1 %345 }
  0xa9   :  { %v344_v62 = vpop.permute.xlu0 %343 }
  0xaa   :  { %v357_v63 = vsel %vm355_vm6, %v342_v58, %v344_v62  ;;  %v358_v5 = vsel %vm355_vm6, %v344_v62, %v346_v61 }
  0xab   :  { %500 = vmatprep.subr.bf16.mxu0 %v357_v63 }
  0xac   :  { %v340_v0 = vpop.permute.xlu1 %339 }
  0xad   :  { %v1058_v1 = vpop.permute.xlu0 %347  ;;  %v356_v3 = vsel %vm355_vm6, %v340_v0, %v342_v58 }
  0xae   :  { %501 = vmatpush1.bf16.msra.mxu0 %v356_v3  ;;  %v359_v4 = vsel %vm355_vm6, %v346_v61, %v1058_v1 }
  0xaf   :  { %543 = vmatprep.subr.bf16.mxu1 %v359_v4 }
  0xb0   :  { %544 = vmatpush1.bf16.msra.mxu1 %v358_v5  ;;  %v382_v6 = vpop.permute.xlu1 %381 }
  0xb1   :  { %v380_v10 = vpop.permute.xlu0 %379 }
  0xb2   :  { %v395_v12 = vsel %vm393_vm7, %v380_v10, %v382_v6 }
  0xb3   :  { %502 = vmatprep.subr.bf16.mxu0 %v395_v12 }
  0xb4   :  { %v1065_v13 = vpop.permute.xlu1 %385 }
  0xb5   :  { %v384_v15 = vpop.permute.xlu0 %383 }
  0xb6   :  { %v397_v16 = vsel %vm393_vm7, %v384_v15, %v1065_v13  ;;  %v396_v17 = vsel %vm393_vm7, %v382_v6, %v384_v15 }
  0xb7   :  { %545 = vmatprep.subr.bf16.mxu1 %v397_v16 }
  0xb8   :  { %546 = vmatpush1.bf16.msra.mxu1 %v396_v17  ;;  %v418_v18 = vpop.permute.xlu1 %417 }
  0xb9   :  { %v378_v19 = vpop.permute.xlu0 %377 }
  0xba   :  { %v394_v20 = vsel %vm393_vm7, %v378_v19, %v380_v10 }
  0xbb   :  { %503 = vmatpush1.bf16.msra.mxu0 %v394_v20 }
  0xbc   :  { %v422_v21 = vpop.permute.xlu1 %421 }
  0xbd   :  { %v420_v22 = vpop.permute.xlu0 %419 }
  0xbe   :  { %v433_v23 = vsel %vm431_vm8, %v418_v18, %v420_v22  ;;  %v434_v30 = vsel %vm431_vm8, %v420_v22, %v422_v21 }
  0xbf   :  { %504 = vmatprep.subr.bf16.mxu0 %v433_v23 }
  0xc0   :  { %v416_v24 = vpop.permute.xlu1 %415 }
  0xc1   :  { %v1072_v25 = vpop.permute.xlu0 %423  ;;  %v432_v27 = vsel %vm431_vm8, %v416_v24, %v418_v18 }
  0xc2   :  { %505 = vmatpush1.bf16.msra.mxu0 %v432_v27  ;;  %v435_v29 = vsel %vm431_vm8, %v422_v21, %v1072_v25 }
  0xc3   :  { %547 = vmatprep.subr.bf16.mxu1 %v435_v29  ;;  %574 = vmatprep.subr.bf16.mxu0 %v943_v9 }
  0xc4   :  { %548 = vmatpush1.bf16.msra.mxu1 %v434_v30  ;;  %v157_v31 = vpop.permute.xlu1 %156 }
  0xc5   :  { %v155_v32 = vpop.permute.xlu0 %154  ;;  %521 = vmatmul.mubr.bf16.vlgmr.msra.gmra.mrb[0].mxu0 %v1078_v28  ;;  %617 = vmatprep.subr.bf16.mxu1 %v954_v11 }
  0xc6   :  { %575 = vmatpush1.bf16.msra.mxu0 %v865_v2  ;;  %v166_v33 = vsel %vm160_vm1, %v155_v32, %v157_v31  ;;  %752 = vmatprep.mubr.msk.bf16.mxu0 %vm484_vm0, %v922_v7  ;;  %v165_v35 = vsel %vm160_vm1, %v992_v14, %v155_v32 }
  0xc7   :  { %564 = vmatmul.mubr.bf16.vlgmr.msra.gmra.mrb[0].mxu1 %v1078_v28  ;;  %576 = vmatprep.subr.bf16.mxu0 %v166_v33 }
  0xc8   :  { %618 = vmatpush1.bf16.msra.mxu1 %v936_v8  ;;  %v181_v9 = vpop.permute.xlu1 %180  ;;  %753 = vmatprep.mubr.msk.bf16.mxu1 %vm484_vm0, %v922_v7 }
  0xc9   :  { %v159_v11 = vpop.permute.xlu0 %158 }
  0xca   :  { %v167_v2 = vsel %vm160_vm1, %v157_v31, %v159_v11  ;;  %577 = vmatpush1.bf16.msra.mxu0 %v165_v35  ;;  %v185_v36 = vsel %vm160_vm1, %v159_v11, %v181_v9 }
  0xcb   :  { %619 = vmatprep.subr.bf16.mxu1 %v185_v36 }
  0xcc   :  { %620 = vmatpush1.bf16.msra.mxu1 %v167_v2  ;;  %v200_v37 = vpop.permute.xlu1 %199 }
  0xcd   :  { %v198_v38 = vpop.permute.xlu0 %197 }
  0xce   :  { %v208_v8 = vsel %vm203_vm2, %v1012_v26, %v198_v38  ;;  %v209_v39 = vsel %vm203_vm2, %v198_v38, %v200_v37 }
  0xcf   :  { %578 = vmatprep.subr.bf16.mxu0 %v209_v39 }
  0xd0   :  { %579 = vmatpush1.bf16.msra.mxu0 %v208_v8  ;;  %v219_v7 = vpop.permute.xlu1 %218 }
  0xd1   :  { %v202_v40 = vpop.permute.xlu0 %201 }
  0xd2   :  { %v210_v14 = vsel %vm203_vm2, %v200_v37, %v202_v40  ;;  %v223_v41 = vsel %vm203_vm2, %v202_v40, %v219_v7 }
  0xd3   :  { %621 = vmatprep.subr.bf16.mxu1 %v223_v41 }
  0xd4   :  { %622 = vmatpush1.bf16.msra.mxu1 %v210_v14  ;;  %v238_v42 = vpop.permute.xlu1 %237 }
  0xd5   :  { %v236_v43 = vpop.permute.xlu0 %235 }
  0xd6   :  { %v246_v44 = vsel %vm241_vm3, %v1027_v34, %v236_v43  ;;  %v247_v45 = vsel %vm241_vm3, %v236_v43, %v238_v42 }
  0xd7   :  { %580 = vmatprep.subr.bf16.mxu0 %v247_v45 }
  0xd8   :  { %581 = vmatpush1.bf16.msra.mxu0 %v246_v44  ;;  %v257_v26 = vpop.permute.xlu1 %256 }
  0xd9   :  { %v240_v46 = vpop.permute.xlu0 %239 }
  0xda   :  { %v248_v48 = vsel %vm241_vm3, %v238_v42, %v240_v46  ;;  %v261_v49 = vsel %vm241_vm3, %v240_v46, %v257_v26 }
  0xdb   :  { %623 = vmatprep.subr.bf16.mxu1 %v261_v49 }
  0xdc   :  { %624 = vmatpush1.bf16.msra.mxu1 %v248_v48  ;;  %v276_v50 = vpop.permute.xlu1 %275 }
  0xdd   :  { %v274_v51 = vpop.permute.xlu0 %273 }
  0xde   :  { %v284_v52 = vsel %vm279_vm4, %v1044_v47, %v274_v51  ;;  %v285_v53 = vsel %vm279_vm4, %v274_v51, %v276_v50 }
  0xdf   :  { %582 = vmatprep.subr.bf16.mxu0 %v285_v53 }
  0xe0   :  { %583 = vmatpush1.bf16.msra.mxu0 %v284_v52  ;;  %v295_v34 = vpop.permute.xlu1 %294 }
  0xe1   :  { %v278_v55 = vpop.permute.xlu0 %277 }
  0xe2   :  { %v286_v56 = vsel %vm279_vm4, %v276_v50, %v278_v55  ;;  %v299_v57 = vsel %vm279_vm4, %v278_v55, %v295_v34 }
  0xe3   :  { %625 = vmatprep.subr.bf16.mxu1 %v299_v57 }
  0xe4   :  { %626 = vmatpush1.bf16.msra.mxu1 %v286_v56  ;;  %v314_v58 = vpop.permute.xlu1 %313 }
  0xe5   :  { %v312_v59 = vpop.permute.xlu0 %311 }
  0xe6   :  { %v322_v60 = vsel %vm317_vm5, %v1051_v54, %v312_v59  ;;  %v323_v61 = vsel %vm317_vm5, %v312_v59, %v314_v58 }
  0xe7   :  { %584 = vmatprep.subr.bf16.mxu0 %v323_v61 }
  0xe8   :  { %585 = vmatpush1.bf16.msra.mxu0 %v322_v60  ;;  %v333_v47 = vpop.permute.xlu1 %332 }
  0xe9   :  { %v316_v62 = vpop.permute.xlu0 %315 }
  0xea   :  { %v324_v63 = vsel %vm317_vm5, %v314_v58, %v316_v62  ;;  %v337_v0 = vsel %vm317_vm5, %v316_v62, %v333_v47 }
  0xeb   :  { %627 = vmatprep.subr.bf16.mxu1 %v337_v0 }
  0xec   :  { %628 = vmatpush1.bf16.msra.mxu1 %v324_v63  ;;  %v352_v3 = vpop.permute.xlu1 %351 }
  0xed   :  { %v350_v4 = vpop.permute.xlu0 %349 }
  0xee   :  { %v360_v5 = vsel %vm355_vm6, %v1058_v1, %v350_v4  ;;  %v361_v6 = vsel %vm355_vm6, %v350_v4, %v352_v3 }
  0xef   :  { %586 = vmatprep.subr.bf16.mxu0 %v361_v6 }
  0xf0   :  { %587 = vmatpush1.bf16.msra.mxu0 %v360_v5  ;;  %v371_v54 = vpop.permute.xlu1 %370 }
  0xf1   :  { %v354_v10 = vpop.permute.xlu0 %353 }
  0xf2   :  { %v362_v12 = vsel %vm355_vm6, %v352_v3, %v354_v10  ;;  %v375_v15 = vsel %vm355_vm6, %v354_v10, %v371_v54 }
  0xf3   :  { %629 = vmatprep.subr.bf16.mxu1 %v375_v15 }
  0xf4   :  { %630 = vmatpush1.bf16.msra.mxu1 %v362_v12  ;;  %v390_v16 = vpop.permute.xlu1 %389 }
  0xf5   :  { %v388_v17 = vpop.permute.xlu0 %387 }
  0xf6   :  { %v398_v18 = vsel %vm393_vm7, %v1065_v13, %v388_v17  ;;  %v399_v19 = vsel %vm393_vm7, %v388_v17, %v390_v16 }
  0xf7   :  { %588 = vmatprep.subr.bf16.mxu0 %v399_v19 }
  0xf8   :  { %589 = vmatpush1.bf16.msra.mxu0 %v398_v18  ;;  %v409_v1 = vpop.permute.xlu1 %408 }
  0xf9   :  { %v392_v20 = vpop.permute.xlu0 %391 }
  0xfa   :  { %v400_v21 = vsel %vm393_vm7, %v390_v16, %v392_v20  ;;  %v413_v22 = vsel %vm393_vm7, %v392_v20, %v409_v1 }
  0xfb   :  { %631 = vmatprep.subr.bf16.mxu1 %v413_v22 }
  0xfc   :  { %632 = vmatpush1.bf16.msra.mxu1 %v400_v21  ;;  %v428_v23 = vpop.permute.xlu1 %427 }
  0xfd   :  { %v426_v24 = vpop.permute.xlu0 %425 }
  0xfe   :  { %v436_v27 = vsel %vm431_vm8, %v1072_v25, %v426_v24  ;;  %v437_v29 = vsel %vm431_vm8, %v426_v24, %v428_v23 }
  0xff   :  { %590 = vmatprep.subr.bf16.mxu0 %v437_v29 }
 0x100   :  { %591 = vmatpush1.bf16.msra.mxu0 %v436_v27  ;;  %v447_v13 = vpop.permute.xlu1 %446 }
 0x101   :  { %v430_v30 = vpop.permute.xlu0 %429 }
 0x102   :  { %v438_v31 = vsel %vm431_vm8, %v428_v23, %v430_v30  ;;  %v451_v32 = vsel %vm431_vm8, %v430_v30, %v447_v13 }
 0x103   :  { %607 = vmatmul.mubr.bf16.vlgmr.msra.gmra.mrb[4].mxu0 %v1078_v28  ;;  %633 = vmatprep.subr.bf16.mxu1 %v451_v32 }
 0x104   :  { %634 = vmatpush1.bf16.msra.mxu1 %v438_v31 }
 0x107   :  { %650 = vmatmul.mubr.bf16.vlgmr.msra.gmra.mrb[4].mxu1 %v1078_v28 }
 0x111   :  { %v468_v51 = vpop.permute.xlu1 %467 }
 0x112   :  { %v1135_v9 = vpop.permute.xlu0 %472 }
 0x198   :  { %v522_v33 = vpop.f32.mrb[0].mxu0 }
 0x199   :  { %v524_v25 = vpop.f32.mrb[1].mxu0  ;;  %v523_v52 = vadd.f32 %v522_v33, %v468_v51 }
 0x19a   :  { %v565_v35 = vpop.f32.mrb[0].mxu1  ;;  %v526_v11 = vpop.f32.mrb[2].mxu0  ;;  %v525_v53 = vadd.f32 %v524_v25, %v468_v51 }
 0x19b   :  { %v567_v2 = vpop.f32.mrb[1].mxu1  ;;  %v527_v36 = vadd.f32 %v526_v11, %v1135_v9  ;;  %v528_v37 = vpop.f32.mrb[3].mxu0  ;;  %v566_v34 = vadd.f32 %v565_v35, %v468_v51 }
 0x19c   :  { %v569_v38 = vpop.f32.mrb[2].mxu1  ;;  %v529_v8 = vadd.f32 %v528_v37, %v1135_v9  ;;  %v568_v56 = vadd.f32 %v567_v2, %v468_v51 }
 0x19d   :  { %v571_v39 = vpop.f32.mrb[3].mxu1  ;;  %v570_v7 = vadd.f32 %v569_v38, %v1135_v9  ;;  %v754_v40 = vmul.f32 -1.442695, %v527_v36 }
 0x19e   :  { %v572_v14 = vadd.f32 %v571_v39, %v1135_v9  ;;  %v755_v28 = vmul.f32 -1.442695, %v529_v8 }
 0x19f   :  { %789 = vpow2.f32 %v754_v40  ;;  %v756_v41 = vmul.f32 -1.442695, %v570_v7 }
 0x1a0   :  { %v757_v42 = vmul.f32 -1.442695, %v572_v14  ;;  %791 = vpow2.f32 %v755_v28 }
 0x1a1   :  { %793 = vpow2.f32 %v756_v41 }
 0x1a2   :  { %795 = vpow2.f32 %v757_v42 }
 0x1a9   :  { %v790_v43 = vpop.eup %789 }
 0x1aa   :  { %v792_v44 = vpop.eup %791  ;;  %v684_v45 = vadd.f32 1.0, %v790_v43 }
 0x1ab   :  { %v794_v26 = vpop.eup %793  ;;  %v685_v46 = vadd.f32 1.0, %v792_v44 }
 0x1ac   :  { %v796_v48 = vpop.eup %795  ;;  %v686_v49 = vadd.f32 1.0, %v794_v26  ;;  %797 = vrcp.f32 %v684_v45 }
 0x1ad   :  { %v687_v50 = vadd.f32 1.0, %v796_v48  ;;  %799 = vrcp.f32 %v685_v46 }
 0x1ae   :  { %801 = vrcp.f32 %v686_v49 }
 0x1af   :  { %803 = vrcp.f32 %v687_v50 }
 0x1b6   :  { %v798_v55 = vpop.eup %797 }
 0x1b7   :  { %v800_v57 = vpop.eup %799  ;;  %v708_v58 = vmul.f32 %v798_v55, %v523_v52 }
 0x1b8   :  { %v802_v59 = vpop.eup %801  ;;  %v709_v60 = vmul.f32 %v800_v57, %v525_v53 }
 0x1b9   :  { %v804_v61 = vpop.eup %803  ;;  %v710_v47 = vmul.f32 %v802_v59, %v566_v34  ;;  %716 = vst [vmem:[%s1173_s4] sm:$0xff] %v708_v58 }
 0x1ba   :  { %v711_v62 = vmul.f32 %v804_v61, %v568_v56  ;;  %717 = vst [vmem:[%s1173_s4 + $0x8] sm:$0xff] %v709_v60 }
 0x1bb   :  { %718 = vst [vmem:[%s1173_s4 + $0x10] sm:$0xff] %v710_v47 }
 0x1bc   :  { %719 = vst [vmem:[%s1173_s4 + $0x18] sm:$0xff] %v711_v62 }
 0x1d6   :  { %v608_v63 = vpop.f32.mrb[4].mxu0 }
 0x1d7   :  { %v610_v0 = vpop.f32.mrb[5].mxu0  ;;  %v609_v31 = vadd.f32 %v608_v63, %v468_v51 }
 0x1d8   :  { %v612_v3 = vpop.f32.mrb[6].mxu0  ;;  %v611_v33 = vadd.f32 %v610_v0, %v468_v51 }
 0x1d9   :  { %v613_v4 = vadd.f32 %v612_v3, %v1135_v9  ;;  %v614_v5 = vpop.f32.mrb[7].mxu0 }
 0x1da   :  { %v615_v6 = vadd.f32 %v614_v5, %v1135_v9  ;;  %v651_v54 = vpop.f32.mrb[4].mxu1 }
 0x1db   :  { %v758_v10 = vmul.f32 -1.442695, %v613_v4  ;;  %v653_v12 = vpop.f32.mrb[5].mxu1  ;;  %v652_v11 = vadd.f32 %v651_v54, %v468_v51 }
 0x1dc   :  { %v759_v15 = vmul.f32 -1.442695, %v615_v6  ;;  %v655_v16 = vpop.f32.mrb[6].mxu1  ;;  %v654_v36 = vadd.f32 %v653_v12, %v468_v51 }
 0x1dd   :  { %805 = vpow2.f32 %v758_v10  ;;  %v656_v17 = vadd.f32 %v655_v16, %v1135_v9  ;;  %v657_v18 = vpop.f32.mrb[7].mxu1 }
 0x1de   :  { %807 = vpow2.f32 %v759_v15  ;;  %v658_v19 = vadd.f32 %v657_v18, %v1135_v9 }
 0x1df   :  { %v760_v1 = vmul.f32 -1.442695, %v656_v17 }
 0x1e0   :  { %v761_v20 = vmul.f32 -1.442695, %v658_v19 }
 0x1e1   :  { %809 = vpow2.f32 %v760_v1 }
 0x1e2   :  { %811 = vpow2.f32 %v761_v20 }
 0x1e7   :  { %v806_v21 = vpop.eup %805 }
 0x1e8   :  { %v808_v22 = vpop.eup %807  ;;  %v688_v23 = vadd.f32 1.0, %v806_v21 }
 0x1e9   :  { %v689_v24 = vadd.f32 1.0, %v808_v22 }
 0x1ea   :  { %813 = vrcp.f32 %v688_v23 }
 0x1eb   :  { %v810_v27 = vpop.eup %809  ;;  %815 = vrcp.f32 %v689_v24 }
 0x1ec   :  { %v812_v29 = vpop.eup %811  ;;  %v690_v13 = vadd.f32 1.0, %v810_v27 }
 0x1ed   :  { %v691_v30 = vadd.f32 1.0, %v812_v29 }
 0x1ee   :  { %817 = vrcp.f32 %v690_v13 }
 0x1ef   :  { %819 = vrcp.f32 %v691_v30 }
 0x1f4   :  { %v814_v32 = vpop.eup %813 }
 0x1f5   :  { %v816_v9 = vpop.eup %815  ;;  %v712_v25 = vmul.f32 %v814_v32, %v609_v31 }
 0x1f6   :  { %v713_v35 = vmul.f32 %v816_v9, %v611_v33 }
 0x1f7   :  { %720 = vst [vmem:[%s1173_s4 + $0x20] sm:$0xff] %v712_v25 }
 0x1f8   :  { %v818_v2 = vpop.eup %817  ;;  %721 = vst [vmem:[%s1173_s4 + $0x28] sm:$0xff] %v713_v35 }
 0x1f9   :  { %v820_v37 = vpop.eup %819  ;;  %v714_v38 = vmul.f32 %v818_v2, %v652_v11 }
 0x1fa   :  { %v715_v8 = vmul.f32 %v820_v37, %v654_v36 }
 0x1fb   :  { %722 = vst [vmem:[%s1173_s4 + $0x30] sm:$0xff] %v714_v38 }
 0x1fc   :  { %723 = vst [vmem:[%s1173_s4 + $0x38] sm:$0xff] %v715_v8 }

</bundles_post_ra>
